<compile_context>
chip_gen: v7x
topology: tpu7x:2x2x1
jax: 0.10.0
libtpu: 0.0.40
codegen_flags: <defaults>
</compile_context>

<pallas_src>
import jax
import jax.numpy as jnp
from jax.experimental import pallas as pl
from jax.experimental.pallas import tpu as pltpu


def policy_kernel(x_ref, w1_ref, b1_ref, w2_ref, b2_ref, o_ref):
    # affine1: bf16 operands, f32 accumulation on the MXU
    h = jnp.dot(x_ref[...], w1_ref[...], preferred_element_type=jnp.float32)
    h = jnp.maximum(h + b1_ref[...], 0.0)          # bias + ReLU in f32
    # affine2: feed MXU in the weight dtype (bf16), accumulate f32
    s = jnp.dot(h.astype(w2_ref.dtype), w2_ref[...],
                preferred_element_type=jnp.float32)
    s = s + b2_ref[...]
    # softmax over dim=1 (features), numerically stable, all f32
    m = jnp.max(s, axis=-1, keepdims=True)
    e = jnp.exp(s - m)
    denom = jnp.sum(e, axis=-1, keepdims=True)
    o_ref[...] = (e * pl.reciprocal(denom, approx=True)).astype(o_ref.dtype)
    # TODO(synk): if profiling ever shows the epilogue store-bound (NOISE_DIM=8
    # lanes < 128 -> masked vst), present a lane-dense (batch*8//128, 128)
    # output slab from the wrapper instead.


def prepare_policy_params(w1, b1, w2, b2, *, param_dtype=jnp.bfloat16):
    """Hoisted out of the hot path: transpose/reshape/cast once at init.
    w1: (128, STATE_SHAPE) torch-layout, b1: (128,)
    w2: (NOISE_DIM, 128)   torch-layout, b2: (NOISE_DIM,)
    """
    w1_t = jnp.asarray(w1).T.astype(param_dtype)              # (STATE_SHAPE, 128)
    w2_t = jnp.asarray(w2).T.astype(param_dtype)              # (128, NOISE_DIM)
    b1_2d = jnp.asarray(b1).reshape(1, -1).astype(jnp.float32)  # (1, 128)
    b2_2d = jnp.asarray(b2).reshape(1, -1).astype(jnp.float32)  # (1, NOISE_DIM)
    return w1_t, b1_2d, w2_t, b2_2d


def policy_forward(x, w1_t, b1_2d, w2_t, b2_2d, *, block_batch=1024):
    """x: any shape reshapeable to (-1, STATE_SHAPE)."""
    state_shape, hidden = w1_t.shape
    noise_dim = w2_t.shape[1]

    x2d = x.reshape(-1, state_shape).astype(w1_t.dtype)
    batch = x2d.shape[0]

    # Batch tile: big (512-2048) to amortize ~0.35us per-grid-step overhead,
    # multiple of 16 (bf16 sublane packing), capped at the (rounded) batch so
    # tiny batches don't over-pad.
    tb = min(block_batch, max(16, ((batch + 15) // 16) * 16))
    padded = ((batch + tb - 1) // tb) * tb
    if padded != batch:
        x2d = jnp.pad(x2d, ((0, padded - batch), (0, 0)))
    grid = (padded // tb,)

    flops = 2 * padded * (state_shape * hidden + hidden * noise_dim)
    bytes_accessed = (
        padded * state_shape * x2d.dtype.itemsize        # x tiles in
        + padded * noise_dim * 4                         # softmax out (f32)
        + w1_t.size * w1_t.dtype.itemsize
        + w2_t.size * w2_t.dtype.itemsize
        + b1_2d.size * 4 + b2_2d.size * 4)

    out = pl.pallas_call(
        policy_kernel,
        out_shape=jax.ShapeDtypeStruct((padded, noise_dim), jnp.float32),
        grid=grid,
        in_specs=[
            pl.BlockSpec((tb, state_shape), lambda i: (i, 0)),       # x tile
            pl.BlockSpec((state_shape, hidden), lambda i: (0, 0)),   # W1 (resident)
            pl.BlockSpec((1, hidden), lambda i: (0, 0)),             # b1 (resident)
            pl.BlockSpec((hidden, noise_dim), lambda i: (0, 0)),     # W2 (resident)
            pl.BlockSpec((1, noise_dim), lambda i: (0, 0)),          # b2 (resident)
        ],
        out_specs=pl.BlockSpec((tb, noise_dim), lambda i: (i, 0)),
        compiler_params=pltpu.CompilerParams(
            dimension_semantics=("parallel",)),
        cost_estimate=pl.CostEstimate(
            flops=flops,
            transcendentals=padded * noise_dim,
            bytes_accessed=bytes_accessed),
    )(x2d, w1_t, b1_2d, w2_t, b2_2d)

    if padded != batch:
        out = out[:batch]   # padded rows' softmax is garbage -> slice off
    return out


def init_params(key, state_shape, noise_dim, hidden=128):
    """Deterministic init mimicking nn.Linear default (uniform +/- 1/sqrt(fan_in))."""
    k1, k2, k3, k4 = jax.random.split(key, 4)
    bound1 = 1.0 / jnp.sqrt(state_shape)
    bound2 = 1.0 / jnp.sqrt(hidden)
    w1 = jax.random.uniform(k1, (hidden, state_shape), jnp.float32, -bound1, bound1)
    b1 = jax.random.uniform(k2, (hidden,), jnp.float32, -bound1, bound1)
    w2 = jax.random.uniform(k3, (noise_dim, hidden), jnp.float32, -bound2, bound2)
    b2 = jax.random.uniform(k4, (noise_dim,), jnp.float32, -bound2, bound2)
    return w1, b1, w2, b2


def _reference(x, w1, b1, w2, b2):
    # Same math as the PyTorch forward, with the kernel's bf16 input/weight
    # casts reproduced so the comparison is apples-to-apples.
    xb = x.astype(jnp.bfloat16).astype(jnp.float32)
    w1b = w1.astype(jnp.bfloat16).astype(jnp.float32)
    w2b = w2.astype(jnp.bfloat16).astype(jnp.float32)
    h = jnp.maximum(xb @ w1b.T + b1, 0.0)
    s = h.astype(jnp.bfloat16).astype(jnp.float32) @ w2b.T + b2
    return jax.nn.softmax(s, axis=1)


if __name__ == "__main__":
    STATE_SHAPE = 16
    NOISE_DIM = 8
    BATCH = 2

    key = jax.random.PRNGKey(0)
    kx, kp = jax.random.split(key)
    x = jax.random.normal(kx, (BATCH, STATE_SHAPE), jnp.float32)
    w1, b1, w2, b2 = init_params(kp, STATE_SHAPE, NOISE_DIM)

    # Transpose / cast once (hot path only sees prepared params).
    w1_t, b1_2d, w2_t, b2_2d = prepare_policy_params(w1, b1, w2, b2)

    out = policy_forward(x, w1_t, b1_2d, w2_t, b2_2d)
    out = jax.block_until_ready(out)

    ref = _reference(x, w1, b1, w2, b2)
    assert out.shape == (BATCH, NOISE_DIM)
    assert jnp.allclose(out, ref, atol=5e-3, rtol=5e-3)
    # approx reciprocal -> rows sum to 1 only to ~1e-3 relative
    assert jnp.allclose(jnp.sum(out, axis=1), 1.0, atol=5e-3)

    # Second check: batch large enough to exercise a multi-step grid + a
    # padded last tile.
    BATCH2 = 515
    x2 = jax.random.normal(jax.random.PRNGKey(1), (BATCH2, STATE_SHAPE), jnp.float32)
    out2 = jax.block_until_ready(
        policy_forward(x2, w1_t, b1_2d, w2_t, b2_2d, block_batch=256))
    ref2 = _reference(x2, w1, b1, w2, b2)
    assert out2.shape == (BATCH2, NOISE_DIM)
    assert jnp.allclose(out2, ref2, atol=5e-3, rtol=5e-3)
    assert jnp.allclose(jnp.sum(out2, axis=1), 1.0, atol=5e-3)

    print("KERNEL_OK")
</pallas_src>

<mosaic_0001>
module attributes {stable_mosaic.version = 11 : i64} {
  func.func @policy_kernel(%arg0: i32, %arg1: memref<16x16xbf16, #tpu.memory_space<vmem>>, %arg2: memref<16x128xbf16, #tpu.memory_space<vmem>>, %arg3: memref<1x128xf32, #tpu.memory_space<vmem>>, %arg4: memref<128x8xbf16, #tpu.memory_space<vmem>>, %arg5: memref<1x8xf32, #tpu.memory_space<vmem>>, %arg6: memref<16x8xf32, #tpu.memory_space<vmem>>) attributes {dimension_semantics = [#tpu.dimension_semantics<parallel>], iteration_bounds = array<i64: 1>, scalar_prefetch = 0 : i64, scratch_operands = 0 : i64, tpu.core_type = #tpu.core_type<tc>, window_params = [{transform_indices = @transform_0, window_bounds = array<i64: 16, 16>}, {pipeline_mode = #tpu.pipeline_mode<synchronous>, transform_indices = @transform_1, window_bounds = array<i64: 16, 128>}, {pipeline_mode = #tpu.pipeline_mode<synchronous>, transform_indices = @transform_2, window_bounds = array<i64: 1, 128>}, {pipeline_mode = #tpu.pipeline_mode<synchronous>, transform_indices = @transform_3, window_bounds = array<i64: 128, 8>}, {pipeline_mode = #tpu.pipeline_mode<synchronous>, transform_indices = @transform_4, window_bounds = array<i64: 1, 8>}, {transform_indices = @transform_5, window_bounds = array<i64: 16, 8>}]} {
    %c0 = arith.constant 0 : index
    %c0_0 = arith.constant 0 : index
    %0 = vector.load %arg1[%c0, %c0_0] : memref<16x16xbf16, #tpu.memory_space<vmem>>, vector<16x16xbf16>
    %c0_1 = arith.constant 0 : index
    %c0_2 = arith.constant 0 : index
    %1 = vector.load %arg2[%c0_1, %c0_2] : memref<16x128xbf16, #tpu.memory_space<vmem>>, vector<16x128xbf16>
    %cst = arith.constant dense<0.000000e+00> : vector<16x128xf32>
    %2 = tpu.matmul %0, %1, %cst {dimension_numbers = #tpu.dot_dimension_numbers<[1], [0], [0], [1], [0, 0, 1, 1], [], []>} : vector<16x16xbf16>, vector<16x128xbf16>, vector<16x128xf32> -> vector<16x128xf32>
    %c0_3 = arith.constant 0 : index
    %c0_4 = arith.constant 0 : index
    %3 = vector.load %arg3[%c0_3, %c0_4] : memref<1x128xf32, #tpu.memory_space<vmem>>, vector<1x128xf32>
    %4 = vector.broadcast %3 : vector<1x128xf32> to vector<16x128xf32>
    %5 = arith.addf %2, %4 : vector<16x128xf32>
    %cst_5 = arith.constant 0.000000e+00 : f32
    %6 = vector.broadcast %cst_5 : f32 to vector<16x128xf32>
    %7 = arith.maximumf %5, %6 : vector<16x128xf32>
    %8 = arith.truncf %7 : vector<16x128xf32> to vector<16x128xbf16>
    %c0_6 = arith.constant 0 : index
    %c0_7 = arith.constant 0 : index
    %9 = vector.load %arg4[%c0_6, %c0_7] : memref<128x8xbf16, #tpu.memory_space<vmem>>, vector<128x8xbf16>
    %cst_8 = arith.constant dense<0.000000e+00> : vector<16x8xf32>
    %10 = tpu.matmul %8, %9, %cst_8 {dimension_numbers = #tpu.dot_dimension_numbers<[1], [0], [0], [1], [0, 0, 1, 1], [], []>} : vector<16x128xbf16>, vector<128x8xbf16>, vector<16x8xf32> -> vector<16x8xf32>
    %c0_9 = arith.constant 0 : index
    %c0_10 = arith.constant 0 : index
    %11 = vector.load %arg5[%c0_9, %c0_10] : memref<1x8xf32, #tpu.memory_space<vmem>>, vector<1x8xf32>
    %12 = vector.broadcast %11 : vector<1x8xf32> to vector<16x8xf32>
    %13 = arith.addf %10, %12 : vector<16x8xf32>
    %cst_11 = arith.constant dense<0xFF800000> : vector<16xf32>
    %14 = vector.multi_reduction <maximumf>, %13, %cst_11 [1] : vector<16x8xf32> to vector<16xf32>
    %15 = vector.shape_cast %14 : vector<16xf32> to vector<16x1xf32>
    %16 = vector.broadcast %15 : vector<16x1xf32> to vector<16x8xf32>
    %17 = arith.subf %13, %16 : vector<16x8xf32>
    %18 = math.exp %17 : vector<16x8xf32>
    %cst_12 = arith.constant dense<0.000000e+00> : vector<16xf32>
    %19 = vector.multi_reduction <add>, %18, %cst_12 [1] : vector<16x8xf32> to vector<16xf32>
    %20 = vector.shape_cast %19 : vector<16xf32> to vector<16x1xf32>
    %21 = tpu.reciprocal %20 {approx = true} : vector<16x1xf32> -> vector<16x1xf32>
    %22 = vector.broadcast %21 : vector<16x1xf32> to vector<16x8xf32>
    %23 = arith.mulf %18, %22 : vector<16x8xf32>
    %c0_13 = arith.constant 0 : index
    %c0_14 = arith.constant 0 : index
    %24 = vector.load %arg6[%c0_13, %c0_14] : memref<16x8xf32, #tpu.memory_space<vmem>>, vector<16x8xf32>
    tpu.vector_store %arg6[%c0_13, %c0_14], %23 {strides = array<i32>} : memref<16x8xf32, #tpu.memory_space<vmem>>, vector<16x8xf32>,
    return
  }
  func.func @transform_0(%arg0: i32) -> (i32, i32) {
    %c0_i32 = arith.constant 0 : i32
    %c0_i32_0 = arith.constant 0 : i32
    return %arg0, %c0_i32 : i32, i32
  }
  func.func @transform_1(%arg0: i32) -> (i32, i32) {
    %c0_i32 = arith.constant 0 : i32
    %c0_i32_0 = arith.constant 0 : i32
    %c0_i32_1 = arith.constant 0 : i32
    return %c0_i32, %c0_i32_0 : i32, i32
  }
  func.func @transform_2(%arg0: i32) -> (i32, i32) {
    %c0_i32 = arith.constant 0 : i32
    %c0_i32_0 = arith.constant 0 : i32
    %c0_i32_1 = arith.constant 0 : i32
    return %c0_i32, %c0_i32_0 : i32, i32
  }
  func.func @transform_3(%arg0: i32) -> (i32, i32) {
    %c0_i32 = arith.constant 0 : i32
    %c0_i32_0 = arith.constant 0 : i32
    %c0_i32_1 = arith.constant 0 : i32
    return %c0_i32, %c0_i32_0 : i32, i32
  }
  func.func @transform_4(%arg0: i32) -> (i32, i32) {
    %c0_i32 = arith.constant 0 : i32
    %c0_i32_0 = arith.constant 0 : i32
    %c0_i32_1 = arith.constant 0 : i32
    return %c0_i32, %c0_i32_0 : i32, i32
  }
  func.func @transform_5(%arg0: i32) -> (i32, i32) {
    %c0_i32 = arith.constant 0 : i32
    %c0_i32_0 = arith.constant 0 : i32
    return %arg0, %c0_i32 : i32, i32
  }
}

</mosaic_0001>

<bundles_post_ra>
// kernel: tpu_custom_call.1
= control target key start
LH: loop header
LB: loop body
LE: loop exit
PB: predicated region body
PF: predicated region fallthrough
CT: control target
= control target key end

     0   :  { %v302_v0 = vmov 0.0   ;;  %vm303_vm0 = vmmov 0   ;;  %vm43_vm1 = vcmask 130048   ;;  %vm203_vm2 = vcmask 64512   ;;  %s382_s1 = inlined_call_operand.vmem [shape: bf16[16,128], index: 1, kind: input, shape index: {}]   ;;  %s383_s0 = inlined_call_operand.vmem [shape: bf16[16,16], index: 0, kind: input, shape index: {}]   ;;  %s384_s3 = inlined_call_operand.vmem [shape: bf16[128,8], index: 3, kind: input, shape index: {}]   ;;  %s385_s2 = inlined_call_operand.vmem [shape: f32[1,128], index: 2, kind: input, shape index: {}]   ;;  %s386_s4 = inlined_call_operand.vmem [shape: f32[1,8], index: 4, kind: input, shape index: {}]   ;;  %s387_s5 = inlined_call_operand.vmem [shape: f32[16,8], index: 5, kind: output, shape index: {}]  }
   0x1   :  { %256 = vmatprep.subr.bf16.mxu0 %v302_v0  ;;  %v284_v1 = vld [vmem:[%s382_s1] sm:$0xff]   ;;  %258 = vmatprep.mubr.msk.bf16.mxu0 %vm303_vm0, %v302_v0  ;;  %v287_v4 = vld [vmem:[%s384_s3 + $0x8] sm:$0xff]   ;;  %v288_v5 = vld [vmem:[%s384_s3 + $0x10] sm:$0xff]  }
   0x2   :  { %v285_v2 = vld [vmem:[%s383_s0] sm:$0xff]   ;;  %262 = vmatprep.subr.bf16.mxu1 %v302_v0  ;;  %278 = vmatprep.mubr.msk.bf16.mxu1 %vm303_vm0, %v302_v0  ;;  %v289_v6 = vld [vmem:[%s384_s3 + $0x18] sm:$0xff]   ;;  %v291_v8 = vld [vmem:[%s384_s3 + $0x28] sm:$0xff]  }
   0x3   :  { %257 = vmatpush3.bf16.msra.mxu0 %v284_v1  ;;  %v286_v3 = vld [vmem:[%s384_s3] sm:$0xff]   ;;  %v292_v9 = vld [vmem:[%s384_s3 + $0x30] sm:$0xff]   ;;  %v293_v10 = vld [vmem:[%s384_s3 + $0x38] sm:$0xff]  }
   0x4   :  { %263 = vmatpush3.bf16.msra.mxu1 %v286_v3  ;;  %v290_v7 = vld [vmem:[%s384_s3 + $0x20] sm:$0xff]  }
   0x5   :  { %264 = vmatprep.subr.bf16.mxu1 %v302_v0  ;;  %v232_v11 = vld [vmem:[%s385_s2] ss:$0 sm:$0xff] }
   0x6   :  { %259 = vmatmul.mubr.msk.bf16.vlgmr.msra.gmra.mrb[0].mxu0 %vm43_vm1, %v285_v2  ;;  %v236_v21 = vld [vmem:[%s386_s4] ss:$0 sm:$0xff] }
   0x8   :  { %265 = vmatpush3.bf16.msra.mxu1 %v287_v4 }
   0x9   :  { %266 = vmatprep.subr.bf16.mxu1 %v302_v0 }
   0xc   :  { %267 = vmatpush3.bf16.msra.mxu1 %v288_v5 }
   0xd   :  { %268 = vmatprep.subr.bf16.mxu1 %v302_v0 }
  0x10   :  { %269 = vmatpush3.bf16.msra.mxu1 %v289_v6 }
  0x11   :  { %270 = vmatprep.subr.bf16.mxu1 %v302_v0 }
  0x14   :  { %271 = vmatpush3.bf16.msra.mxu1 %v290_v7 }
  0x15   :  { %272 = vmatprep.subr.bf16.mxu1 %v302_v0 }
  0x18   :  { %273 = vmatpush3.bf16.msra.mxu1 %v291_v8 }
  0x19   :  { %274 = vmatprep.subr.bf16.mxu1 %v302_v0 }
  0x1c   :  { %275 = vmatpush3.bf16.msra.mxu1 %v292_v9 }
  0x1d   :  { %276 = vmatprep.subr.bf16.mxu1 %v302_v0 }
  0x20   :  { %277 = vmatpush3.bf16.msra.mxu1 %v293_v10 }
  0xd9   :  { %v81_v12 = vpop.f32.mrb[0].mxu0 }
  0xda   :  { %v82_v13 = vadd.f32 %v232_v11, %v81_v12  ;;  %v260_v14 = vpop.f32.mrb[1].mxu0 }
  0xdb   :  { %v84_v15 = vpop.f32.mrb[2].mxu0 }
  0xdc   :  { %v85_v16 = vadd.f32 %v232_v11, %v84_v15  ;;  %v261_v17 = vpop.f32.mrb[3].mxu0  ;;  %v88_v18 = vmax.f32 %v82_v13, 0.0 }
  0xde   :  { %v89_v19 = vmax.f32 %v85_v16, 0.0 }
  0xe0   :  { %v90_v20 = vpack.c.bf16 %v89_v19, %v88_v18 }
  0xe2   :  { %279 = vmatmul.mubr.bf16.vlgmr.msra.gmra.mrb[0].mxu1 %v90_v20 }
 0x1b5   :  { %v196_v22 = vpop.f32.mrb[0].mxu1 }
 0x1b6   :  { %v197_v23 = vadd.f32 %v236_v21, %v196_v22  ;;  %v280_v24 = vpop.f32.mrb[1].mxu1 }
 0x1b7   :  { %v199_v25 = vpop.f32.mrb[2].mxu1 }
 0x1b8   :  { %v200_v26 = vadd.f32 %v236_v21, %v199_v25  ;;  %v281_v27 = vpop.f32.mrb[3].mxu1  ;;  %v204_v28 = vsel %vm203_vm2, %v197_v23, -inf }
 0x1b9   :  { %205 = vmax.xlane.f32.xlu0 %v204_v28 }
 0x1ba   :  { %v207_v29 = vsel %vm203_vm2, %v200_v26, -inf }
 0x1bd   :  { %208 = vmax.xlane.f32.xlu0 %v207_v29 }
 0x246   :  { %v206_v30 = vpop.xlane.xlu0 %205 }
 0x247   :  { %v210_v31 = vsub.f32 %v197_v23, %v206_v30 }
 0x249   :  { %v212_v32 = vmul.f32 1.442695, %v210_v31 }
 0x24a   :  { %v209_v33 = vpop.xlane.xlu0 %208 }
 0x24b   :  { %294 = vpow2.f32 %v212_v32  ;;  %v211_v34 = vsub.f32 %v200_v26, %v209_v33 }
 0x24d   :  { %v214_v35 = vmul.f32 1.442695, %v211_v34 }
 0x24f   :  { %296 = vpow2.f32 %v214_v35 }
 0x255   :  { %v295_v36 = vpop.eup %294 }
 0x256   :  { %v216_v37 = vsel %vm203_vm2, %v295_v36, 0.0 }
 0x257   :  { %217 = vadd.xlane.f32.xlu1 %v216_v37 }
 0x259   :  { %v297_v38 = vpop.eup %296 }
 0x25a   :  { %v219_v39 = vsel %vm203_vm2, %v297_v38, 0.0 }
 0x25b   :  { %220 = vadd.xlane.f32.xlu1 %v219_v39 }
 0x2e4   :  { %v218_v40 = vpop.xlane.xlu1 %217 }
 0x2e5   :  { %298 = vrcp.f32 %v218_v40 }
 0x2e8   :  { %v221_v41 = vpop.xlane.xlu1 %220 }
 0x2e9   :  { %300 = vrcp.f32 %v221_v41 }
 0x2ef   :  { %v299_v42 = vpop.eup %298 }
 0x2f0   :  { %v224_v43 = vmul.f32 %v299_v42, %v295_v36 }
 0x2f2   :  { %226 = vst.msk [vmem:[%s387_s5] sm:$0xff] %vm203_vm2, %v224_v43 }
 0x2f3   :  { %v301_v44 = vpop.eup %300 }
 0x2f4   :  { %v225_v45 = vmul.f32 %v301_v44, %v297_v38 }
 0x2f6   :  { %227 = vst.msk [vmem:[%s387_s5 + $0x8] sm:$0xff] %vm203_vm2, %v225_v45 }

</bundles_post_ra>
